<compile_context>
chip_gen: v7x
topology: tpu7x:2x2x1
jax: 0.10.0
libtpu: 0.0.40
codegen_flags: <defaults>
</compile_context>

<pallas_src>
import functools

import jax
import jax.numpy as jnp
from jax import lax
from jax.experimental import pallas as pl
from jax.experimental.pallas import tpu as pltpu

KSIZE = 5        # conv kernel size
PAD = 2          # conv padding
BN_EPS = 1e-5


def _expand_block_kernel(x_ref, w1_ref, b1_ref, cw_ref, cb_ref, gamma_ref,
                         beta_ref, o_ref):
    """Whole ExpandBlock forward for one (B, H) batch.

    x_ref    : (B, H)      VMEM bf16  input
    w1_ref   : (H, H)      VMEM bf16  fc1 weight in PyTorch (out, in) layout
    b1_ref   : (1, H)      VMEM f32   fc1 bias
    cw_ref   : (C*K,)      SMEM f32   conv1d weight, flattened (in_channels==1)
    cb_ref   : (C,)        SMEM f32   conv1d bias
    gamma_ref: (C,)        SMEM f32   batchnorm weight
    beta_ref : (C,)        SMEM f32   batchnorm bias
    o_ref    : (C, B, H)   VMEM f32   output (channel-major)

    Note: H must be the full (untiled) hidden dim — the roll-based conv relies
    on the block spanning the whole lane extent.
    """
    B, H = x_ref.shape
    C = o_ref.shape[0]

    # --- fc1: h = x @ W1^T + b1 ---
    # bf16 operands, f32 MXU accumulation; contract x's H with w1's in-axis (1)
    # so no separate weight transpose is ever materialized.
    h = lax.dot_general(
        x_ref[...], w1_ref[...],
        dimension_numbers=(((1,), (1,)), ((), ())),
        preferred_element_type=jnp.float32)
    h = h + b1_ref[...]                                   # (B, H) f32

    # --- conv1d with in_channels = 1, kernel = 5, padding = 2 ---
    # out[b, c, l] = sum_k w[c, k] * h[b, l + k - 2]   (zero outside [0, H))
    # Build the shifted/zero-masked copies of h once (XLU rolls), reuse per
    # channel.  The zero shift (k == PAD) needs no roll and no mask.
    lane = lax.broadcasted_iota(jnp.int32, (B, H), dimension=1)
    shifted = []
    for k in range(KSIZE):
        s = k - PAD                                       # out[l] = h[l + s]
        if s == 0:
            shifted.append(h)
        else:
            rolled = pltpu.roll(h, shift=(-s) % H, axis=1)
            valid = (lane + s >= 0) & (lane + s < H)
            shifted.append(jnp.where(valid, rolled, 0.0))

    # --- conv accumulate for every output channel (fully unrolled) ---
    chans = []
    for c in range(C):
        acc = cw_ref[c * KSIZE] * shifted[0]
        for k in range(1, KSIZE):
            acc = acc + cw_ref[c * KSIZE + k] * shifted[k]
        chans.append(acc + cb_ref[c])

    # --- BatchNorm1d (training-mode batch stats) + ReLU ---
    # One-pass stats (sum, sum of squares); the per-channel chains are
    # independent so their reductions / rsqrt can overlap.
    inv_n = 1.0 / (B * H)
    outs = []
    for c in range(C):
        yc = chans[c]
        s1 = jnp.sum(yc)
        s2 = jnp.sum(yc * yc)
        mean = s1 * inv_n
        var = s2 * inv_n - mean * mean                    # biased variance
        scale = gamma_ref[c] * lax.rsqrt(var + BN_EPS)
        shift = beta_ref[c] - mean * scale
        outs.append(jnp.maximum(yc * scale + shift, 0.0))

    # --- single bulk lane-dense store (C, B, H) ---
    o_ref[...] = jnp.stack(outs, axis=0).astype(o_ref.dtype)


@functools.partial(jax.jit, static_argnames=("expand_channels",))
def expand_block(x, w1, b1, conv_w, conv_b, bn_gamma, bn_beta,
                 expand_channels=5):
    """x: (B, H) float32.  Returns (B, C, H) float32, matching the PyTorch module."""
    B, H = x.shape
    C = expand_channels

    # bf16 MXU operands (the kernel accumulates in f32).  PyTorch (out, in)
    # layout is kept as-is; the kernel contracts against axis 1 of w1, so no
    # wrapper transpose / extra HBM round-trip of the weight.
    x_bf = x.astype(jnp.bfloat16)
    w1_bf = w1.astype(jnp.bfloat16)
    b1_row = b1.reshape(1, H).astype(jnp.float32)
    cw_flat = conv_w.reshape(C * KSIZE).astype(jnp.float32)   # 1-D SMEM array

    # Advisory cost estimate so XLA schedules sensibly around this tiny op.
    flops = 2 * B * H * H + 2 * B * H * C * KSIZE + 12 * B * H * C
    bytes_accessed = (x_bf.size * 2 + w1_bf.size * 2 + b1_row.size * 4
                      + (cw_flat.size + 3 * C) * 4 + C * B * H * 4)

    out_cbh = pl.pallas_call(
        _expand_block_kernel,
        out_shape=jax.ShapeDtypeStruct((C, B, H), jnp.float32),
        in_specs=[
            pl.BlockSpec(memory_space=pltpu.MemorySpace.VMEM),   # x (bf16)
            pl.BlockSpec(memory_space=pltpu.MemorySpace.VMEM),   # w1 (bf16)
            pl.BlockSpec(memory_space=pltpu.MemorySpace.VMEM),   # b1 (f32)
            pl.BlockSpec(memory_space=pltpu.MemorySpace.SMEM),   # conv weight (C*K,)
            pl.BlockSpec(memory_space=pltpu.MemorySpace.SMEM),   # conv bias (C,)
            pl.BlockSpec(memory_space=pltpu.MemorySpace.SMEM),   # bn gamma (C,)
            pl.BlockSpec(memory_space=pltpu.MemorySpace.SMEM),   # bn beta (C,)
        ],
        out_specs=pl.BlockSpec(memory_space=pltpu.MemorySpace.VMEM),
        cost_estimate=pl.CostEstimate(flops=flops, transcendentals=C,
                                      bytes_accessed=bytes_accessed),
        # Note: at larger H, set pltpu.CompilerParams(vmem_limit_bytes=...) —
        # the resident (H, H) weight hits v7x's 64 MiB / v5e's 16 MiB scoped
        # VMEM limits long before v6e's.
    )(x_bf, w1_bf, b1_row, cw_flat,
      conv_b.astype(jnp.float32), bn_gamma.astype(jnp.float32),
      bn_beta.astype(jnp.float32))

    # PyTorch's forward returns NCL (B, C, H).  The kernel stores channel-major
    # (C, B, H) (one lane-dense bulk store); this layout transpose is noise at
    # these sizes and can be dropped by consumers that accept channel-major.
    return jnp.transpose(out_cbh, (1, 0, 2))


def _reference(x, w1, b1, conv_w, conv_b, bn_gamma, bn_beta):
    """Pure-JAX f32 reference of the PyTorch forward (training-mode BN)."""
    B, H = x.shape
    C = conv_w.shape[0]
    h = x @ w1.T + b1                                     # fc1
    hp = jnp.pad(h, ((0, 0), (PAD, PAD)))                 # (B, H + 4)
    cw = conv_w.reshape(C, KSIZE)
    y = jnp.stack(
        [sum(cw[c, k] * hp[:, k:k + H] for k in range(KSIZE)) + conv_b[c]
         for c in range(C)], axis=1)                      # (B, C, H)
    mean = jnp.mean(y, axis=(0, 2), keepdims=True)
    var = jnp.mean((y - mean) ** 2, axis=(0, 2), keepdims=True)
    y = (y - mean) * lax.rsqrt(var + BN_EPS)
    y = bn_gamma.reshape(1, C, 1) * y + bn_beta.reshape(1, C, 1)
    return jnp.maximum(y, 0.0)


if __name__ == "__main__":
    B, H, C = 8, 128, 5   # batch, hidden_dim, expand_channels

    key = jax.random.PRNGKey(0)
    kx, kw1, kb1, kcw, kcb = jax.random.split(key, 5)

    x = jax.random.normal(kx, (B, H), dtype=jnp.float32)

    # fc1 params (PyTorch layout: weight (out, in), bias (out,))
    lim_fc = 1.0 / jnp.sqrt(H)
    w1 = jax.random.uniform(kw1, (H, H), jnp.float32, -lim_fc, lim_fc)
    b1 = jax.random.uniform(kb1, (H,), jnp.float32, -lim_fc, lim_fc)

    # conv1 params (weight (C, 1, K), bias (C,))
    lim_cv = 1.0 / jnp.sqrt(1 * KSIZE)
    conv_w = jax.random.uniform(kcw, (C, 1, KSIZE), jnp.float32, -lim_cv, lim_cv)
    conv_b = jax.random.uniform(kcb, (C,), jnp.float32, -lim_cv, lim_cv)

    # batchnorm affine params (PyTorch default init)
    bn_gamma = jnp.ones((C,), jnp.float32)
    bn_beta = jnp.zeros((C,), jnp.float32)

    out = expand_block(x, w1, b1, conv_w, conv_b, bn_gamma, bn_beta,
                       expand_channels=C)
    out = jax.block_until_ready(out)

    ref = _reference(x, w1, b1, conv_w, conv_b, bn_gamma, bn_beta)
    assert out.shape == (B, C, H)
    # Tolerance accounts for the bf16 MXU operands (f32 accumulation); the
    # post-matmul conv/BN/ReLU math is all f32.  Observed error is a few 1e-3.
    assert jnp.allclose(out, ref, atol=2e-2, rtol=2e-2), "mismatch vs reference"

    print("KERNEL_OK")
</pallas_src>

<mosaic_0001>
module attributes {stable_mosaic.version = 11 : i64} {
  func.func @_expand_block_kernel(%arg0: memref<8x128xbf16, #tpu.memory_space<vmem>>, %arg1: memref<128x128xbf16, #tpu.memory_space<vmem>>, %arg2: memref<1x128xf32, #tpu.memory_space<vmem>>, %arg3: memref<25xf32, #tpu.memory_space<smem>>, %arg4: memref<5xf32, #tpu.memory_space<smem>>, %arg5: memref<5xf32, #tpu.memory_space<smem>>, %arg6: memref<5xf32, #tpu.memory_space<smem>>, %arg7: memref<5x8x128xf32, #tpu.memory_space<vmem>>) attributes {dimension_semantics = [], scalar_prefetch = 0 : i64, scratch_operands = 0 : i64, tpu.core_type = #tpu.core_type<tc>} {
    %c0 = arith.constant 0 : index
    %c0_0 = arith.constant 0 : index
    %0 = vector.load %arg0[%c0, %c0_0] : memref<8x128xbf16, #tpu.memory_space<vmem>>, vector<8x128xbf16>
    %c0_1 = arith.constant 0 : index
    %c0_2 = arith.constant 0 : index
    %1 = vector.load %arg1[%c0_1, %c0_2] : memref<128x128xbf16, #tpu.memory_space<vmem>>, vector<128x128xbf16>
    %cst = arith.constant dense<0.000000e+00> : vector<8x128xf32>
    %2 = tpu.matmul %0, %1, %cst {dimension_numbers = #tpu.dot_dimension_numbers<[1], [1], [0], [0], [0, 0, 1, 0], [], []>} : vector<8x128xbf16>, vector<128x128xbf16>, vector<8x128xf32> -> vector<8x128xf32>
    %c0_3 = arith.constant 0 : index
    %c0_4 = arith.constant 0 : index
    %3 = vector.load %arg2[%c0_3, %c0_4] : memref<1x128xf32, #tpu.memory_space<vmem>>, vector<1x128xf32>
    %4 = vector.broadcast %3 : vector<1x128xf32> to vector<8x128xf32>
    %5 = arith.addf %2, %4 : vector<8x128xf32>
    %6 = tpu.iota {dimensions = array<i32: 1>} : vector<8x128xi32>
    %c2_i32 = arith.constant 2 : i32
    %7 = tpu.dynamic_rotate %5 by %c2_i32 dim 1 : vector<8x128xf32>, i32 -> vector<8x128xf32>
    %c-2_i32 = arith.constant -2 : i32
    %8 = vector.broadcast %c-2_i32 : i32 to vector<8x128xi32>
    %9 = arith.addi %6, %8 : vector<8x128xi32>
    %c0_i32 = arith.constant 0 : i32
    %10 = vector.broadcast %c0_i32 : i32 to vector<8x128xi32>
    %11 = arith.cmpi sge, %9, %10 : vector<8x128xi32>
    %c-2_i32_5 = arith.constant -2 : i32
    %12 = vector.broadcast %c-2_i32_5 : i32 to vector<8x128xi32>
    %13 = arith.addi %6, %12 : vector<8x128xi32>
    %c128_i32 = arith.constant 128 : i32
    %14 = vector.broadcast %c128_i32 : i32 to vector<8x128xi32>
    %15 = arith.cmpi slt, %13, %14 : vector<8x128xi32>
    %16 = arith.andi %11, %15 : vector<8x128xi1>
    %cst_6 = arith.constant 0.000000e+00 : f32
    %17 = vector.broadcast %cst_6 : f32 to vector<8x128xf32>
    %18 = arith.select %16, %7, %17 : vector<8x128xi1>, vector<8x128xf32>
    %c1_i32 = arith.constant 1 : i32
    %19 = tpu.dynamic_rotate %5 by %c1_i32 dim 1 : vector<8x128xf32>, i32 -> vector<8x128xf32>
    %c-1_i32 = arith.constant -1 : i32
    %20 = vector.broadcast %c-1_i32 : i32 to vector<8x128xi32>
    %21 = arith.addi %6, %20 : vector<8x128xi32>
    %c0_i32_7 = arith.constant 0 : i32
    %22 = vector.broadcast %c0_i32_7 : i32 to vector<8x128xi32>
    %23 = arith.cmpi sge, %21, %22 : vector<8x128xi32>
    %c-1_i32_8 = arith.constant -1 : i32
    %24 = vector.broadcast %c-1_i32_8 : i32 to vector<8x128xi32>
    %25 = arith.addi %6, %24 : vector<8x128xi32>
    %c128_i32_9 = arith.constant 128 : i32
    %26 = vector.broadcast %c128_i32_9 : i32 to vector<8x128xi32>
    %27 = arith.cmpi slt, %25, %26 : vector<8x128xi32>
    %28 = arith.andi %23, %27 : vector<8x128xi1>
    %cst_10 = arith.constant 0.000000e+00 : f32
    %29 = vector.broadcast %cst_10 : f32 to vector<8x128xf32>
    %30 = arith.select %28, %19, %29 : vector<8x128xi1>, vector<8x128xf32>
    %c127_i32 = arith.constant 127 : i32
    %31 = tpu.dynamic_rotate %5 by %c127_i32 dim 1 : vector<8x128xf32>, i32 -> vector<8x128xf32>
    %c1_i32_11 = arith.constant 1 : i32
    %32 = vector.broadcast %c1_i32_11 : i32 to vector<8x128xi32>
    %33 = arith.addi %6, %32 : vector<8x128xi32>
    %c0_i32_12 = arith.constant 0 : i32
    %34 = vector.broadcast %c0_i32_12 : i32 to vector<8x128xi32>
    %35 = arith.cmpi sge, %33, %34 : vector<8x128xi32>
    %c1_i32_13 = arith.constant 1 : i32
    %36 = vector.broadcast %c1_i32_13 : i32 to vector<8x128xi32>
    %37 = arith.addi %6, %36 : vector<8x128xi32>
    %c128_i32_14 = arith.constant 128 : i32
    %38 = vector.broadcast %c128_i32_14 : i32 to vector<8x128xi32>
    %39 = arith.cmpi slt, %37, %38 : vector<8x128xi32>
    %40 = arith.andi %35, %39 : vector<8x128xi1>
    %cst_15 = arith.constant 0.000000e+00 : f32
    %41 = vector.broadcast %cst_15 : f32 to vector<8x128xf32>
    %42 = arith.select %40, %31, %41 : vector<8x128xi1>, vector<8x128xf32>
    %c126_i32 = arith.constant 126 : i32
    %43 = tpu.dynamic_rotate %5 by %c126_i32 dim 1 : vector<8x128xf32>, i32 -> vector<8x128xf32>
    %c2_i32_16 = arith.constant 2 : i32
    %44 = vector.broadcast %c2_i32_16 : i32 to vector<8x128xi32>
    %45 = arith.addi %6, %44 : vector<8x128xi32>
    %c0_i32_17 = arith.constant 0 : i32
    %46 = vector.broadcast %c0_i32_17 : i32 to vector<8x128xi32>
    %47 = arith.cmpi sge, %45, %46 : vector<8x128xi32>
    %c2_i32_18 = arith.constant 2 : i32
    %48 = vector.broadcast %c2_i32_18 : i32 to vector<8x128xi32>
    %49 = arith.addi %6, %48 : vector<8x128xi32>
    %c128_i32_19 = arith.constant 128 : i32
    %50 = vector.broadcast %c128_i32_19 : i32 to vector<8x128xi32>
    %51 = arith.cmpi slt, %49, %50 : vector<8x128xi32>
    %52 = arith.andi %47, %51 : vector<8x128xi1>
    %cst_20 = arith.constant 0.000000e+00 : f32
    %53 = vector.broadcast %cst_20 : f32 to vector<8x128xf32>
    %54 = arith.select %52, %43, %53 : vector<8x128xi1>, vector<8x128xf32>
    %c0_21 = arith.constant 0 : index
    %55 = memref.load %arg3[%c0_21] : memref<25xf32, #tpu.memory_space<smem>>
    %56 = vector.broadcast %55 : f32 to vector<8x128xf32>
    %57 = arith.mulf %56, %18 : vector<8x128xf32>
    %c1 = arith.constant 1 : index
    %58 = memref.load %arg3[%c1] : memref<25xf32, #tpu.memory_space<smem>>
    %59 = vector.broadcast %58 : f32 to vector<8x128xf32>
    %60 = arith.mulf %59, %30 : vector<8x128xf32>
    %61 = arith.addf %57, %60 : vector<8x128xf32>
    %c2 = arith.constant 2 : index
    %62 = memref.load %arg3[%c2] : memref<25xf32, #tpu.memory_space<smem>>
    %63 = vector.broadcast %62 : f32 to vector<8x128xf32>
    %64 = arith.mulf %63, %5 : vector<8x128xf32>
    %65 = arith.addf %61, %64 : vector<8x128xf32>
    %c3 = arith.constant 3 : index
    %66 = memref.load %arg3[%c3] : memref<25xf32, #tpu.memory_space<smem>>
    %67 = vector.broadcast %66 : f32 to vector<8x128xf32>
    %68 = arith.mulf %67, %42 : vector<8x128xf32>
    %69 = arith.addf %65, %68 : vector<8x128xf32>
    %c4 = arith.constant 4 : index
    %70 = memref.load %arg3[%c4] : memref<25xf32, #tpu.memory_space<smem>>
    %71 = vector.broadcast %70 : f32 to vector<8x128xf32>
    %72 = arith.mulf %71, %54 : vector<8x128xf32>
    %73 = arith.addf %69, %72 : vector<8x128xf32>
    %c0_22 = arith.constant 0 : index
    %74 = memref.load %arg4[%c0_22] : memref<5xf32, #tpu.memory_space<smem>>
    %75 = vector.broadcast %74 : f32 to vector<8x128xf32>
    %76 = arith.addf %73, %75 : vector<8x128xf32>
    %c5 = arith.constant 5 : index
    %77 = memref.load %arg3[%c5] : memref<25xf32, #tpu.memory_space<smem>>
    %78 = vector.broadcast %77 : f32 to vector<8x128xf32>
    %79 = arith.mulf %78, %18 : vector<8x128xf32>
    %c6 = arith.constant 6 : index
    %80 = memref.load %arg3[%c6] : memref<25xf32, #tpu.memory_space<smem>>
    %81 = vector.broadcast %80 : f32 to vector<8x128xf32>
    %82 = arith.mulf %81, %30 : vector<8x128xf32>
    %83 = arith.addf %79, %82 : vector<8x128xf32>
    %c7 = arith.constant 7 : index
    %84 = memref.load %arg3[%c7] : memref<25xf32, #tpu.memory_space<smem>>
    %85 = vector.broadcast %84 : f32 to vector<8x128xf32>
    %86 = arith.mulf %85, %5 : vector<8x128xf32>
    %87 = arith.addf %83, %86 : vector<8x128xf32>
    %c8 = arith.constant 8 : index
    %88 = memref.load %arg3[%c8] : memref<25xf32, #tpu.memory_space<smem>>
    %89 = vector.broadcast %88 : f32 to vector<8x128xf32>
    %90 = arith.mulf %89, %42 : vector<8x128xf32>
    %91 = arith.addf %87, %90 : vector<8x128xf32>
    %c9 = arith.constant 9 : index
    %92 = memref.load %arg3[%c9] : memref<25xf32, #tpu.memory_space<smem>>
    %93 = vector.broadcast %92 : f32 to vector<8x128xf32>
    %94 = arith.mulf %93, %54 : vector<8x128xf32>
    %95 = arith.addf %91, %94 : vector<8x128xf32>
    %c1_23 = arith.constant 1 : index
    %96 = memref.load %arg4[%c1_23] : memref<5xf32, #tpu.memory_space<smem>>
    %97 = vector.broadcast %96 : f32 to vector<8x128xf32>
    %98 = arith.addf %95, %97 : vector<8x128xf32>
    %c10 = arith.constant 10 : index
    %99 = memref.load %arg3[%c10] : memref<25xf32, #tpu.memory_space<smem>>
    %100 = vector.broadcast %99 : f32 to vector<8x128xf32>
    %101 = arith.mulf %100, %18 : vector<8x128xf32>
    %c11 = arith.constant 11 : index
    %102 = memref.load %arg3[%c11] : memref<25xf32, #tpu.memory_space<smem>>
    %103 = vector.broadcast %102 : f32 to vector<8x128xf32>
    %104 = arith.mulf %103, %30 : vector<8x128xf32>
    %105 = arith.addf %101, %104 : vector<8x128xf32>
    %c12 = arith.constant 12 : index
    %106 = memref.load %arg3[%c12] : memref<25xf32, #tpu.memory_space<smem>>
    %107 = vector.broadcast %106 : f32 to vector<8x128xf32>
    %108 = arith.mulf %107, %5 : vector<8x128xf32>
    %109 = arith.addf %105, %108 : vector<8x128xf32>
    %c13 = arith.constant 13 : index
    %110 = memref.load %arg3[%c13] : memref<25xf32, #tpu.memory_space<smem>>
    %111 = vector.broadcast %110 : f32 to vector<8x128xf32>
    %112 = arith.mulf %111, %42 : vector<8x128xf32>
    %113 = arith.addf %109, %112 : vector<8x128xf32>
    %c14 = arith.constant 14 : index
    %114 = memref.load %arg3[%c14] : memref<25xf32, #tpu.memory_space<smem>>
    %115 = vector.broadcast %114 : f32 to vector<8x128xf32>
    %116 = arith.mulf %115, %54 : vector<8x128xf32>
    %117 = arith.addf %113, %116 : vector<8x128xf32>
    %c2_24 = arith.constant 2 : index
    %118 = memref.load %arg4[%c2_24] : memref<5xf32, #tpu.memory_space<smem>>
    %119 = vector.broadcast %118 : f32 to vector<8x128xf32>
    %120 = arith.addf %117, %119 : vector<8x128xf32>
    %c15 = arith.constant 15 : index
    %121 = memref.load %arg3[%c15] : memref<25xf32, #tpu.memory_space<smem>>
    %122 = vector.broadcast %121 : f32 to vector<8x128xf32>
    %123 = arith.mulf %122, %18 : vector<8x128xf32>
    %c16 = arith.constant 16 : index
    %124 = memref.load %arg3[%c16] : memref<25xf32, #tpu.memory_space<smem>>
    %125 = vector.broadcast %124 : f32 to vector<8x128xf32>
    %126 = arith.mulf %125, %30 : vector<8x128xf32>
    %127 = arith.addf %123, %126 : vector<8x128xf32>
    %c17 = arith.constant 17 : index
    %128 = memref.load %arg3[%c17] : memref<25xf32, #tpu.memory_space<smem>>
    %129 = vector.broadcast %128 : f32 to vector<8x128xf32>
    %130 = arith.mulf %129, %5 : vector<8x128xf32>
    %131 = arith.addf %127, %130 : vector<8x128xf32>
    %c18 = arith.constant 18 : index
    %132 = memref.load %arg3[%c18] : memref<25xf32, #tpu.memory_space<smem>>
    %133 = vector.broadcast %132 : f32 to vector<8x128xf32>
    %134 = arith.mulf %133, %42 : vector<8x128xf32>
    %135 = arith.addf %131, %134 : vector<8x128xf32>
    %c19 = arith.constant 19 : index
    %136 = memref.load %arg3[%c19] : memref<25xf32, #tpu.memory_space<smem>>
    %137 = vector.broadcast %136 : f32 to vector<8x128xf32>
    %138 = arith.mulf %137, %54 : vector<8x128xf32>
    %139 = arith.addf %135, %138 : vector<8x128xf32>
    %c3_25 = arith.constant 3 : index
    %140 = memref.load %arg4[%c3_25] : memref<5xf32, #tpu.memory_space<smem>>
    %141 = vector.broadcast %140 : f32 to vector<8x128xf32>
    %142 = arith.addf %139, %141 : vector<8x128xf32>
    %c20 = arith.constant 20 : index
    %143 = memref.load %arg3[%c20] : memref<25xf32, #tpu.memory_space<smem>>
    %144 = vector.broadcast %143 : f32 to vector<8x128xf32>
    %145 = arith.mulf %144, %18 : vector<8x128xf32>
    %c21 = arith.constant 21 : index
    %146 = memref.load %arg3[%c21] : memref<25xf32, #tpu.memory_space<smem>>
    %147 = vector.broadcast %146 : f32 to vector<8x128xf32>
    %148 = arith.mulf %147, %30 : vector<8x128xf32>
    %149 = arith.addf %145, %148 : vector<8x128xf32>
    %c22 = arith.constant 22 : index
    %150 = memref.load %arg3[%c22] : memref<25xf32, #tpu.memory_space<smem>>
    %151 = vector.broadcast %150 : f32 to vector<8x128xf32>
    %152 = arith.mulf %151, %5 : vector<8x128xf32>
    %153 = arith.addf %149, %152 : vector<8x128xf32>
    %c23 = arith.constant 23 : index
    %154 = memref.load %arg3[%c23] : memref<25xf32, #tpu.memory_space<smem>>
    %155 = vector.broadcast %154 : f32 to vector<8x128xf32>
    %156 = arith.mulf %155, %42 : vector<8x128xf32>
    %157 = arith.addf %153, %156 : vector<8x128xf32>
    %c24 = arith.constant 24 : index
    %158 = memref.load %arg3[%c24] : memref<25xf32, #tpu.memory_space<smem>>
    %159 = vector.broadcast %158 : f32 to vector<8x128xf32>
    %160 = arith.mulf %159, %54 : vector<8x128xf32>
    %161 = arith.addf %157, %160 : vector<8x128xf32>
    %c4_26 = arith.constant 4 : index
    %162 = memref.load %arg4[%c4_26] : memref<5xf32, #tpu.memory_space<smem>>
    %163 = vector.broadcast %162 : f32 to vector<8x128xf32>
    %164 = arith.addf %161, %163 : vector<8x128xf32>
    %165 = vector.shape_cast %76 : vector<8x128xf32> to vector<1x8x128xf32>
    %cst_27 = arith.constant dense<0.000000e+00> : vector<1xf32>
    %166 = vector.multi_reduction <add>, %165, %cst_27 [1, 2] : vector<1x8x128xf32> to vector<1xf32>
    %167 = vector.shape_cast %166 : vector<1xf32> to vector<1x1x1xf32>
    %168 = vector.extract %167[0, 0, 0] : f32 from vector<1x1x1xf32>
    %169 = arith.mulf %76, %76 : vector<8x128xf32>
    %170 = vector.shape_cast %169 : vector<8x128xf32> to vector<1x8x128xf32>
    %cst_28 = arith.constant dense<0.000000e+00> : vector<1xf32>
    %171 = vector.multi_reduction <add>, %170, %cst_28 [1, 2] : vector<1x8x128xf32> to vector<1xf32>
    %172 = vector.shape_cast %171 : vector<1xf32> to vector<1x1x1xf32>
    %173 = vector.extract %172[0, 0, 0] : f32 from vector<1x1x1xf32>
    %cst_29 = arith.constant 9.765625E-4 : f32
    %174 = arith.mulf %168, %cst_29 : f32
    %cst_30 = arith.constant 9.765625E-4 : f32
    %175 = arith.mulf %173, %cst_30 : f32
    %176 = arith.mulf %174, %174 : f32
    %177 = arith.subf %175, %176 : f32
    %c0_31 = arith.constant 0 : index
    %178 = memref.load %arg5[%c0_31] : memref<5xf32, #tpu.memory_space<smem>>
    %cst_32 = arith.constant 9.99999974E-6 : f32
    %179 = arith.addf %177, %cst_32 : f32
    %180 = math.rsqrt %179 : f32
    %181 = arith.mulf %178, %180 : f32
    %c0_33 = arith.constant 0 : index
    %182 = memref.load %arg6[%c0_33] : memref<5xf32, #tpu.memory_space<smem>>
    %183 = arith.mulf %174, %181 : f32
    %184 = arith.subf %182, %183 : f32
    %185 = vector.broadcast %181 : f32 to vector<8x128xf32>
    %186 = arith.mulf %76, %185 : vector<8x128xf32>
    %187 = vector.broadcast %184 : f32 to vector<8x128xf32>
    %188 = arith.addf %186, %187 : vector<8x128xf32>
    %cst_34 = arith.constant 0.000000e+00 : f32
    %189 = vector.broadcast %cst_34 : f32 to vector<8x128xf32>
    %190 = arith.maximumf %188, %189 : vector<8x128xf32>
    %191 = vector.shape_cast %98 : vector<8x128xf32> to vector<1x8x128xf32>
    %cst_35 = arith.constant dense<0.000000e+00> : vector<1xf32>
    %192 = vector.multi_reduction <add>, %191, %cst_35 [1, 2] : vector<1x8x128xf32> to vector<1xf32>
    %193 = vector.shape_cast %192 : vector<1xf32> to vector<1x1x1xf32>
    %194 = vector.extract %193[0, 0, 0] : f32 from vector<1x1x1xf32>
    %195 = arith.mulf %98, %98 : vector<8x128xf32>
    %196 = vector.shape_cast %195 : vector<8x128xf32> to vector<1x8x128xf32>
    %cst_36 = arith.constant dense<0.000000e+00> : vector<1xf32>
    %197 = vector.multi_reduction <add>, %196, %cst_36 [1, 2] : vector<1x8x128xf32> to vector<1xf32>
    %198 = vector.shape_cast %197 : vector<1xf32> to vector<1x1x1xf32>
    %199 = vector.extract %198[0, 0, 0] : f32 from vector<1x1x1xf32>
    %cst_37 = arith.constant 9.765625E-4 : f32
    %200 = arith.mulf %194, %cst_37 : f32
    %cst_38 = arith.constant 9.765625E-4 : f32
    %201 = arith.mulf %199, %cst_38 : f32
    %202 = arith.mulf %200, %200 : f32
    %203 = arith.subf %201, %202 : f32
    %c1_39 = arith.constant 1 : index
    %204 = memref.load %arg5[%c1_39] : memref<5xf32, #tpu.memory_space<smem>>
    %cst_40 = arith.constant 9.99999974E-6 : f32
    %205 = arith.addf %203, %cst_40 : f32
    %206 = math.rsqrt %205 : f32
    %207 = arith.mulf %204, %206 : f32
    %c1_41 = arith.constant 1 : index
    %208 = memref.load %arg6[%c1_41] : memref<5xf32, #tpu.memory_space<smem>>
    %209 = arith.mulf %200, %207 : f32
    %210 = arith.subf %208, %209 : f32
    %211 = vector.broadcast %207 : f32 to vector<8x128xf32>
    %212 = arith.mulf %98, %211 : vector<8x128xf32>
    %213 = vector.broadcast %210 : f32 to vector<8x128xf32>
    %214 = arith.addf %212, %213 : vector<8x128xf32>
    %cst_42 = arith.constant 0.000000e+00 : f32
    %215 = vector.broadcast %cst_42 : f32 to vector<8x128xf32>
    %216 = arith.maximumf %214, %215 : vector<8x128xf32>
    %217 = vector.shape_cast %120 : vector<8x128xf32> to vector<1x8x128xf32>
    %cst_43 = arith.constant dense<0.000000e+00> : vector<1xf32>
    %218 = vector.multi_reduction <add>, %217, %cst_43 [1, 2] : vector<1x8x128xf32> to vector<1xf32>
    %219 = vector.shape_cast %218 : vector<1xf32> to vector<1x1x1xf32>
    %220 = vector.extract %219[0, 0, 0] : f32 from vector<1x1x1xf32>
    %221 = arith.mulf %120, %120 : vector<8x128xf32>
    %222 = vector.shape_cast %221 : vector<8x128xf32> to vector<1x8x128xf32>
    %cst_44 = arith.constant dense<0.000000e+00> : vector<1xf32>
    %223 = vector.multi_reduction <add>, %222, %cst_44 [1, 2] : vector<1x8x128xf32> to vector<1xf32>
    %224 = vector.shape_cast %223 : vector<1xf32> to vector<1x1x1xf32>
    %225 = vector.extract %224[0, 0, 0] : f32 from vector<1x1x1xf32>
    %cst_45 = arith.constant 9.765625E-4 : f32
    %226 = arith.mulf %220, %cst_45 : f32
    %cst_46 = arith.constant 9.765625E-4 : f32
    %227 = arith.mulf %225, %cst_46 : f32
    %228 = arith.mulf %226, %226 : f32
    %229 = arith.subf %227, %228 : f32
    %c2_47 = arith.constant 2 : index
    %230 = memref.load %arg5[%c2_47] : memref<5xf32, #tpu.memory_space<smem>>
    %cst_48 = arith.constant 9.99999974E-6 : f32
    %231 = arith.addf %229, %cst_48 : f32
    %232 = math.rsqrt %231 : f32
    %233 = arith.mulf %230, %232 : f32
    %c2_49 = arith.constant 2 : index
    %234 = memref.load %arg6[%c2_49] : memref<5xf32, #tpu.memory_space<smem>>
    %235 = arith.mulf %226, %233 : f32
    %236 = arith.subf %234, %235 : f32
    %237 = vector.broadcast %233 : f32 to vector<8x128xf32>
    %238 = arith.mulf %120, %237 : vector<8x128xf32>
    %239 = vector.broadcast %236 : f32 to vector<8x128xf32>
    %240 = arith.addf %238, %239 : vector<8x128xf32>
    %cst_50 = arith.constant 0.000000e+00 : f32
    %241 = vector.broadcast %cst_50 : f32 to vector<8x128xf32>
    %242 = arith.maximumf %240, %241 : vector<8x128xf32>
    %243 = vector.shape_cast %142 : vector<8x128xf32> to vector<1x8x128xf32>
    %cst_51 = arith.constant dense<0.000000e+00> : vector<1xf32>
    %244 = vector.multi_reduction <add>, %243, %cst_51 [1, 2] : vector<1x8x128xf32> to vector<1xf32>
    %245 = vector.shape_cast %244 : vector<1xf32> to vector<1x1x1xf32>
    %246 = vector.extract %245[0, 0, 0] : f32 from vector<1x1x1xf32>
    %247 = arith.mulf %142, %142 : vector<8x128xf32>
    %248 = vector.shape_cast %247 : vector<8x128xf32> to vector<1x8x128xf32>
    %cst_52 = arith.constant dense<0.000000e+00> : vector<1xf32>
    %249 = vector.multi_reduction <add>, %248, %cst_52 [1, 2] : vector<1x8x128xf32> to vector<1xf32>
    %250 = vector.shape_cast %249 : vector<1xf32> to vector<1x1x1xf32>
    %251 = vector.extract %250[0, 0, 0] : f32 from vector<1x1x1xf32>
    %cst_53 = arith.constant 9.765625E-4 : f32
    %252 = arith.mulf %246, %cst_53 : f32
    %cst_54 = arith.constant 9.765625E-4 : f32
    %253 = arith.mulf %251, %cst_54 : f32
    %254 = arith.mulf %252, %252 : f32
    %255 = arith.subf %253, %254 : f32
    %c3_55 = arith.constant 3 : index
    %256 = memref.load %arg5[%c3_55] : memref<5xf32, #tpu.memory_space<smem>>
    %cst_56 = arith.constant 9.99999974E-6 : f32
    %257 = arith.addf %255, %cst_56 : f32
    %258 = math.rsqrt %257 : f32
    %259 = arith.mulf %256, %258 : f32
    %c3_57 = arith.constant 3 : index
    %260 = memref.load %arg6[%c3_57] : memref<5xf32, #tpu.memory_space<smem>>
    %261 = arith.mulf %252, %259 : f32
    %262 = arith.subf %260, %261 : f32
    %263 = vector.broadcast %259 : f32 to vector<8x128xf32>
    %264 = arith.mulf %142, %263 : vector<8x128xf32>
    %265 = vector.broadcast %262 : f32 to vector<8x128xf32>
    %266 = arith.addf %264, %265 : vector<8x128xf32>
    %cst_58 = arith.constant 0.000000e+00 : f32
    %267 = vector.broadcast %cst_58 : f32 to vector<8x128xf32>
    %268 = arith.maximumf %266, %267 : vector<8x128xf32>
    %269 = vector.shape_cast %164 : vector<8x128xf32> to vector<1x8x128xf32>
    %cst_59 = arith.constant dense<0.000000e+00> : vector<1xf32>
    %270 = vector.multi_reduction <add>, %269, %cst_59 [1, 2] : vector<1x8x128xf32> to vector<1xf32>
    %271 = vector.shape_cast %270 : vector<1xf32> to vector<1x1x1xf32>
    %272 = vector.extract %271[0, 0, 0] : f32 from vector<1x1x1xf32>
    %273 = arith.mulf %164, %164 : vector<8x128xf32>
    %274 = vector.shape_cast %273 : vector<8x128xf32> to vector<1x8x128xf32>
    %cst_60 = arith.constant dense<0.000000e+00> : vector<1xf32>
    %275 = vector.multi_reduction <add>, %274, %cst_60 [1, 2] : vector<1x8x128xf32> to vector<1xf32>
    %276 = vector.shape_cast %275 : vector<1xf32> to vector<1x1x1xf32>
    %277 = vector.extract %276[0, 0, 0] : f32 from vector<1x1x1xf32>
    %cst_61 = arith.constant 9.765625E-4 : f32
    %278 = arith.mulf %272, %cst_61 : f32
    %cst_62 = arith.constant 9.765625E-4 : f32
    %279 = arith.mulf %277, %cst_62 : f32
    %280 = arith.mulf %278, %278 : f32
    %281 = arith.subf %279, %280 : f32
    %c4_63 = arith.constant 4 : index
    %282 = memref.load %arg5[%c4_63] : memref<5xf32, #tpu.memory_space<smem>>
    %cst_64 = arith.constant 9.99999974E-6 : f32
    %283 = arith.addf %281, %cst_64 : f32
    %284 = math.rsqrt %283 : f32
    %285 = arith.mulf %282, %284 : f32
    %c4_65 = arith.constant 4 : index
    %286 = memref.load %arg6[%c4_65] : memref<5xf32, #tpu.memory_space<smem>>
    %287 = arith.mulf %278, %285 : f32
    %288 = arith.subf %286, %287 : f32
    %289 = vector.broadcast %285 : f32 to vector<8x128xf32>
    %290 = arith.mulf %164, %289 : vector<8x128xf32>
    %291 = vector.broadcast %288 : f32 to vector<8x128xf32>
    %292 = arith.addf %290, %291 : vector<8x128xf32>
    %cst_66 = arith.constant 0.000000e+00 : f32
    %293 = vector.broadcast %cst_66 : f32 to vector<8x128xf32>
    %294 = arith.maximumf %292, %293 : vector<8x128xf32>
    %295 = vector.shape_cast %190 : vector<8x128xf32> to vector<1x8x128xf32>
    %296 = vector.shape_cast %216 : vector<8x128xf32> to vector<1x8x128xf32>
    %297 = vector.shape_cast %242 : vector<8x128xf32> to vector<1x8x128xf32>
    %298 = vector.shape_cast %268 : vector<8x128xf32> to vector<1x8x128xf32>
    %299 = vector.shape_cast %294 : vector<8x128xf32> to vector<1x8x128xf32>
    %300 = tpu.concatenate %295, %296, %297, %298, %299 in 0 : vector<1x8x128xf32>, vector<1x8x128xf32>, vector<1x8x128xf32>, vector<1x8x128xf32>, vector<1x8x128xf32> -> vector<5x8x128xf32>
    %c0_67 = arith.constant 0 : index
    %c0_68 = arith.constant 0 : index
    %c0_69 = arith.constant 0 : index
    %301 = vector.load %arg7[%c0_67, %c0_68, %c0_69] : memref<5x8x128xf32, #tpu.memory_space<vmem>>, vector<5x8x128xf32>
    tpu.vector_store %arg7[%c0_67, %c0_68, %c0_69], %300 {strides = array<i32>} : memref<5x8x128xf32, #tpu.memory_space<vmem>>, vector<5x8x128xf32>,
    return
  }
}

</mosaic_0001>

<bundles_post_ra>
// kernel: expand_block.1
= control target key start
LH: loop header
LB: loop body
LE: loop exit
PB: predicated region body
PF: predicated region fallthrough
CT: control target
= control target key end

     0   :  { %12 = vsyncpa [#allocation4], 0  ;;  %s1012_s0 = inlined_call_operand.vmem [shape: bf16[8,128], index: 0, kind: input, shape index: {}]   ;;  %s1013_s1 = inlined_call_operand.vmem [shape: bf16[128,128], index: 1, kind: input, shape index: {}]   ;;  %s1014_s2 = inlined_call_operand.vmem [shape: f32[1,128], index: 2, kind: input, shape index: {}]   ;;  %s1015_s3 = inlined_call_operand.vmem [shape: f32[25], index: 3, kind: input, shape index: {}]   ;;  %s1016_s4 = inlined_call_operand.vmem [shape: f32[5], index: 4, kind: input, shape index: {}]   ;;  %s1017_s5 = inlined_call_operand.vmem [shape: f32[5], index: 5, kind: input, shape index: {}]   ;;  %s1018_s6 = inlined_call_operand.vmem [shape: f32[5], index: 6, kind: input, shape index: {}]   ;;  %s1019_s7 = inlined_call_operand.hbm [shape: f32[5,8,128], index: 7, kind: output, shape index: {}]  }
   0x1   :  { %13 = vsyncpa [#allocation6], 0 }
   0x2   :  { %14 = vsyncpa [#allocation9], 0  ;;  %s38_s26 = sshll.u32 %s1016_s4, 4  ;;  %s39_s26 = int_to_ptr.vmem [resolvable:$true] %s38_s26 }
   0x3   :  { %15 = vsyncpa [#allocation3], 0  ;;  %s28_s29 = sshll.u32 %s1015_s3, 4  ;;  %s672_s30 = scalar_lea.vmem %s39_s26, 16  ;;  %s29_s29 = int_to_ptr.vmem [resolvable:$true] %s28_s29 }
   0x4   :  { %p673_p0 = scmp.ne.s32.totalorder %s39_s26, %s672_s30  ;;  %p677_p1 = scmp.lt.s32.totalorder %s39_s26, %s39_s26 }
   0x5   :  { %p678_p2 = scmp.lt.s32.totalorder %s672_s30, %s672_s30 }
   0x7   :  { %p679_p3 = por %p678_p2, %p677_p1 }
   0x9   :  { %p680_p4 = pnand %p679_p3, %p673_p0 }
   0xb   :  { %683 = shalt.err (!%p680_p4)
}
   0xc   :  { %s750_s8 = smov [#allocation5]   ;;  %s684_s9 = scalar_lea.vmem %s29_s29, 16 }
   0xd   :  { %41 = dma.vmem_to_smem %s39_s26, 16, %s750_s8, [#allocation6]  }
   0xe   :  { %p685_p5 = scmp.ne.s32.totalorder %s29_s29, %s684_s9  ;;  %p689_p6 = scmp.lt.s32.totalorder %s29_s29, %s29_s29 }
   0xf   :  { %p690_p7 = scmp.lt.s32.totalorder %s684_s9, %s684_s9 }
  0x11   :  { %p691_p8 = por %p690_p7, %p689_p6 }
  0x13   :  { %p692_p9 = pnand %p691_p8, %p685_p5 }
  0x15   :  { %695 = shalt.err (!%p692_p9)
}
  0x16   :  { %s751_s4 = smov [#allocation2]   ;;  %s48_s11 = sshll.u32 %s1017_s5, 4  ;;  %s49_s11 = int_to_ptr.vmem [resolvable:$true] %s48_s11 }
  0x17   :  { %31 = dma.vmem_to_smem %s29_s29, 16, %s751_s4, [#allocation4]  }
  0x18   :  { %s58_s14 = sshll.u32 %s1018_s6, 4  ;;  %s696_s15 = scalar_lea.vmem %s49_s11, 16  ;;  %s59_s14 = int_to_ptr.vmem [resolvable:$true] %s58_s14 }
  0x19   :  { %p697_p10 = scmp.ne.s32.totalorder %s49_s11, %s696_s15  ;;  %p701_p11 = scmp.lt.s32.totalorder %s49_s11, %s49_s11 }
  0x1a   :  { %p702_p12 = scmp.lt.s32.totalorder %s696_s15, %s696_s15 }
  0x1c   :  { %p703_p13 = por %p702_p12, %p701_p11 }
  0x1e   :  { %p704_p0 = pnand %p703_p13, %p697_p10 }
  0x20   :  { %707 = shalt.err (!%p704_p0)
}
  0x21   :  { %s752_s16 = smov [#allocation7]   ;;  %s708_s17 = scalar_lea.vmem %s59_s14, 16 }
  0x22   :  { %51 = dma.vmem_to_smem %s49_s11, 16, %s752_s16, [#allocation6]  }
  0x23   :  { %p709_p1 = scmp.ne.s32.totalorder %s59_s14, %s708_s17  ;;  %p713_p2 = scmp.lt.s32.totalorder %s59_s14, %s59_s14 }
  0x24   :  { %p714_p3 = scmp.lt.s32.totalorder %s708_s17, %s708_s17 }
  0x26   :  { %p715_p4 = por %p714_p3, %p713_p2 }
  0x28   :  { %p716_p5 = pnand %p715_p4, %p709_p1 }
  0x2a   :  { %719 = shalt.err (!%p716_p5)
}
  0x2b   :  { %s753_s5 = smov [#allocation8]  }
  0x2c   :  { %61 = dma.vmem_to_smem %s59_s14, 16, %s753_s5, [#allocation9]  }
  0x2d   :  { %742 = dma.done.wait [#allocation4], 16  }
  0x2e   :  { %743 = vsyncadd [#allocation4], 4294967280 }
  0x2f   :  { %744 = dma.done.wait [#allocation6], 32  }
  0x30   :  { %745 = vsyncadd [#allocation6], 4294967264 }
  0x31   :  { %746 = dma.done.wait [#allocation9], 16  }
  0x32   :  { %747 = vsyncadd [#allocation9], 4294967280 }
  0x33   :  { %74 = sfence }
  0x34   :  { %v654_v0 = vld [vmem:[%s1013_s1] sm:$0xff]   ;;  %v754_v1 = vmov 0.0   ;;  %vm755_vm0 = vmmov 0   ;;  %v655_v2 = vld [vmem:[%s1013_s1 + $0x8] sm:$0xff]   ;;  %v656_v3 = vld [vmem:[%s1013_s1 + $0x10] sm:$0xff]   ;;  %s756_s12 = smov 127   ;;  %v188_v16 = vlaneseq }
  0x35   :  { %591 = vmatprep.subr.bf16.mxu0 %v754_v1  ;;  %607 = vmatprep.mubr.msk.bf16.mxu0 %vm755_vm0, %v754_v1  ;;  %v657_v4 = vld [vmem:[%s1013_s1 + $0x18] sm:$0xff]   ;;  %v658_v5 = vld [vmem:[%s1013_s1 + $0x20] sm:$0xff]   ;;  %v659_v6 = vld [vmem:[%s1013_s1 + $0x28] sm:$0xff]   ;;  %s757_s13 = smov 2   ;;  %s853_s14 = sld [smem:[#allocation2 + $0x7]] }
  0x36   :  { %592 = vmatpush3.bf16.xpose.msra.mxu0 %v654_v0  ;;  %v660_v7 = vld [vmem:[%s1013_s1 + $0x30] sm:$0xff]   ;;  %v661_v8 = vld [vmem:[%s1013_s1 + $0x38] sm:$0xff]   ;;  %v76_v9 = vld [vmem:[%s1012_s0] sm:$0xf]  ;;  %s758_s1 = smov 126   ;;  %s759_s0 = smov 1  }
  0x37   :  { %593 = vmatprep.subr.bf16.mxu0 %v754_v1  ;;  %v537_v10 = vld [vmem:[%s1014_s2] ss:$0 sm:$0xff]  ;;  %s851_s2 = sld [smem:[#allocation2 + $0x2]]  ;;  %s855_s15 = sld [smem:[#allocation2 + $0xc]]  ;;  %v189_v17 = vand.u32 127, %v188_v16 }
  0x38   :  { %s857_s16 = sld [smem:[#allocation2 + $0x11]]  ;;  %s859_s17 = sld [smem:[#allocation2 + $0x3]] }
  0x39   :  { %s861_s5 = sld [smem:[#allocation2 + $0x8]]  ;;  %s863_s6 = sld [smem:[#allocation2 + $0xd]]  ;;  %v192_v18 = vadd.s32 4294967294, %v189_v17  ;;  %v206_v19 = vadd.s32 1, %v189_v17  ;;  %v199_v20 = vadd.s32 4294967295, %v189_v17  ;;  %v213_v23 = vadd.s32 2, %v189_v17 }
  0x3a   :  { %s865_s18 = sld [smem:[#allocation2]]  ;;  %s867_s19 = sld [smem:[#allocation2 + $0x5]] }
  0x3b   :  { %s869_s20 = sld [smem:[#allocation2 + $0xa]]  ;;  %s871_s21 = sld [smem:[#allocation2 + $0xf]]  ;;  %vm193_vm1 = vcmp.ge.s32.totalorder %v192_v18, 0  ;;  %v248_v24 = vstv %s853_s14  ;;  %vm208_vm2 = vcmp.lt.s32.totalorder %v206_v19, 128  ;;  %vm200_vm3 = vcmp.ge.s32.totalorder %v199_v20, 0 }
  0x3c   :  { %s873_s22 = sld [smem:[#allocation2 + $0x14]]  ;;  %s877_s24 = sld [smem:[#allocation2 + $0x1]]  ;;  %vm215_vm4 = vcmp.lt.s32.totalorder %v213_v23, 128 }
  0x3d   :  { %s875_s23 = sld [smem:[#allocation2 + $0x4]]  ;;  %s879_s25 = sld [smem:[#allocation2 + $0x6]]  ;;  %v226_v21 = vstv %s851_s2  ;;  %v270_v25 = vstv %s855_s15 }
  0x3e   :  { %594 = vmatpush3.bf16.xpose.msra.mxu0 %v655_v2  ;;  %s881_s26 = sld [smem:[#allocation2 + $0xb]]  ;;  %s883_s27 = sld [smem:[#allocation2 + $0x9]]  ;;  %v230_v26 = vstv %s859_s17  ;;  %v292_v29 = vstv %s857_s16 }
  0x3f   :  { %595 = vmatprep.subr.bf16.mxu0 %v754_v1  ;;  %s885_s28 = sld [smem:[#allocation2 + $0x10]]  ;;  %s887_s29 = sld [smem:[#allocation2 + $0x15]]  ;;  %v252_v27 = vstv %s861_s5  ;;  %v274_v30 = vstv %s863_s6 }
  0x40   :  { %v219_v31 = vstv %s865_s18  ;;  %v241_v32 = vstv %s867_s19  ;;  %s905_s30 = sld [smem:[#allocation2 + $0x16]]  ;;  %s907_s8 = sld [smem:[#allocation2 + $0x12]] }
  0x41   :  { %v263_v33 = vstv %s869_s20  ;;  %v285_v34 = vstv %s871_s21  ;;  %s915_s9 = sld [smem:[#allocation2 + $0xe]]  ;;  %s918_s4 = sld [smem:[#allocation5]] }
  0x42   :  { %v307_v35 = vstv %s873_s22  ;;  %v222_v37 = vstv %s877_s24  ;;  %s923_s3 = sld [smem:[#allocation2 + $0x17]]  ;;  %s927_s10 = sld [smem:[#allocation2 + $0x13]] }
  0x43   :  { %v244_v38 = vstv %s879_s25  ;;  %v234_v41 = vstv %s875_s23  ;;  %s930_s11 = sld [smem:[#allocation5 + $0x1]]  ;;  %s351_s18 = sld [smem:[#allocation7]] }
  0x44   :  { %v266_v39 = vstv %s881_s26  ;;  %v256_v42 = vstv %s883_s27  ;;  %s357_s19 = sld [smem:[#allocation8]] }
  0x45   :  { %v288_v43 = vstv %s885_s28  ;;  %v310_v48 = vstv %s887_s29 }
  0x46   :  { %596 = vmatpush3.bf16.xpose.msra.mxu0 %v656_v3 }
  0x47   :  { %597 = vmatprep.subr.bf16.mxu0 %v754_v1  ;;  %v238_v17 = vstv %s918_s4 }
  0x4e   :  { %598 = vmatpush3.bf16.xpose.msra.mxu0 %v657_v4 }
  0x4f   :  { %599 = vmatprep.subr.bf16.mxu0 %v754_v1 }
  0x56   :  { %600 = vmatpush3.bf16.xpose.msra.mxu0 %v658_v5 }
  0x57   :  { %601 = vmatprep.subr.bf16.mxu0 %v754_v1 }
  0x5e   :  { %602 = vmatpush3.bf16.xpose.msra.mxu0 %v659_v6 }
  0x5f   :  { %603 = vmatprep.subr.bf16.mxu0 %v754_v1 }
  0x66   :  { %604 = vmatpush3.bf16.xpose.msra.mxu0 %v660_v7 }
  0x67   :  { %605 = vmatprep.subr.bf16.mxu0 %v754_v1 }
  0x6e   :  { %606 = vmatpush3.bf16.xpose.msra.mxu0 %v661_v8  ;;  %v314_v8 = vstv %s905_s30 }
  0x75   :  { %608 = vmatmul.mubr.bf16.vlgmr.msra.gmra.mrb[0].mxu0 %v76_v9 }
 0x148   :  { %v182_v11 = vpop.f32.mrb[0].mxu0 }
 0x149   :  { %v845_v12 = vadd.f32 %v537_v10, %v182_v11  ;;  %v609_v13 = vpop.f32.mrb[1].mxu0 }
 0x14a   :  { %v185_v14 = vpop.f32.mrb[2].mxu0 }
 0x14b   :  { %204 = vrot.lane.b32.xlu1 %v845_v12, %s756_s12  ;;  %190 = vrot.lane.b32.xlu0 %v845_v12, %s757_s13  ;;  %v610_v15 = vpop.f32.mrb[3].mxu0  ;;  %v227_v55 = vmul.f32 %v226_v21, %v845_v12  ;;  %v249_v56 = vmul.f32 %v248_v24, %v845_v12  ;;  %v271_v57 = vmul.f32 %v270_v25, %v845_v12  ;;  %s933_s12 = sld [smem:[#allocation5 + $0x2]]  ;;  %v296_v14 = vstv %s907_s8  ;;  %s939_s13 = sld [smem:[#allocation2 + $0x18]] }
 0x14c   :  { %v293_v7 = vmul.f32 %v292_v29, %v845_v12  ;;  %v278_v15 = vstv %s915_s9  ;;  %v260_v29 = vstv %s930_s11  ;;  %s574_s8 = sld [smem:[#allocation7 + $0x1]] }
 0x14d   :  { %s575_s9 = sld [smem:[#allocation8 + $0x1]] }
 0x14f   :  { %211 = vrot.lane.b32.xlu1 %v845_v12, %s758_s1  ;;  %197 = vrot.lane.b32.xlu0 %v845_v12, %s759_s0  ;;  %s567_s1 = sld [smem:[#allocation5 + $0x3]]  ;;  %s573_s0 = sld [smem:[#allocation5 + $0x4]] }
 0x1bd   :  { %v191_v22 = vpop.permute.xlu0 %190  ;;  %v205_v28 = vpop.permute.xlu1 %204 }
 0x1be   :  { %v196_v36 = vsel %vm193_vm1, %v191_v22, 0.0  ;;  %v913_v45 = vsel %vm208_vm2, %v205_v28, 0.0  ;;  %v315_v22 = vmul.f32 %v314_v8, %v845_v12  ;;  %v300_v28 = vstv %s927_s10 }
 0x1bf   :  { %v220_v46 = vmul.f32 %v219_v31, %v196_v36  ;;  %v242_v47 = vmul.f32 %v241_v32, %v196_v36  ;;  %v264_v49 = vmul.f32 %v263_v33, %v196_v36  ;;  %v286_v58 = vmul.f32 %v285_v34, %v196_v36 }
 0x1c0   :  { %v231_v62 = vmul.f32 %v230_v26, %v913_v45  ;;  %v253_v63 = vmul.f32 %v252_v27, %v913_v45  ;;  %v275_v6 = vmul.f32 %v274_v30, %v913_v45  ;;  %v308_v9 = vmul.f32 %v307_v35, %v196_v36 }
 0x1c1   :  { %v198_v40 = vpop.permute.xlu0 %197  ;;  %v212_v50 = vpop.permute.xlu1 %211  ;;  %v297_v23 = vmul.f32 %v296_v14, %v913_v45  ;;  %v318_v27 = vstv %s923_s3  ;;  %v282_v34 = vstv %s933_s12 }
 0x1c2   :  { %v203_v44 = vsel %vm200_vm3, %v198_v40, 0.0  ;;  %v217_v0 = vsel %vm215_vm4, %v212_v50, 0.0  ;;  %v319_v12 = vmul.f32 %v318_v27, %v913_v45 }
 0x1c3   :  { %v223_v51 = vmul.f32 %v222_v37, %v203_v44  ;;  %v245_v52 = vmul.f32 %v244_v38, %v203_v44  ;;  %v267_v53 = vmul.f32 %v266_v39, %v203_v44  ;;  %v289_v54 = vmul.f32 %v288_v43, %v203_v44 }
 0x1c4   :  { %v311_v1 = vmul.f32 %v310_v48, %v203_v44  ;;  %v235_v10 = vmul.f32 %v234_v41, %v217_v0  ;;  %v257_v16 = vmul.f32 %v256_v42, %v217_v0  ;;  %v279_v24 = vmul.f32 %v278_v15, %v217_v0 }
 0x1c5   :  { %v224_v59 = vadd.f32 %v223_v51, %v220_v46  ;;  %v246_v60 = vadd.f32 %v245_v52, %v242_v47  ;;  %v268_v61 = vadd.f32 %v267_v53, %v264_v49  ;;  %v290_v2 = vadd.f32 %v289_v54, %v286_v58 }
 0x1c6   :  { %v312_v18 = vadd.f32 %v311_v1, %v308_v9  ;;  %v301_v35 = vmul.f32 %v300_v28, %v217_v0  ;;  %v322_v37 = vstv %s939_s13  ;;  %v304_v41 = vstv %s567_s1 }
 0x1c7   :  { %v228_v3 = vadd.f32 %v227_v55, %v224_v59  ;;  %v250_v4 = vadd.f32 %v249_v56, %v246_v60  ;;  %v272_v5 = vadd.f32 %v271_v57, %v268_v61  ;;  %v294_v21 = vadd.f32 %v293_v7, %v290_v2 }
 0x1c8   :  { %v316_v33 = vadd.f32 %v315_v22, %v312_v18  ;;  %v323_v42 = vmul.f32 %v322_v37, %v217_v0  ;;  %v326_v46 = vstv %s573_s0 }
 0x1c9   :  { %v232_v11 = vadd.f32 %v231_v62, %v228_v3  ;;  %v254_v13 = vadd.f32 %v253_v63, %v250_v4  ;;  %v276_v20 = vadd.f32 %v275_v6, %v272_v5  ;;  %v298_v32 = vadd.f32 %v297_v23, %v294_v21 }
 0x1ca   :  { %v320_v40 = vadd.f32 %v319_v12, %v316_v33 }
 0x1cb   :  { %v236_v19 = vadd.f32 %v235_v10, %v232_v11  ;;  %v258_v26 = vadd.f32 %v257_v16, %v254_v13  ;;  %v280_v31 = vadd.f32 %v279_v24, %v276_v20  ;;  %v302_v39 = vadd.f32 %v301_v35, %v298_v32 }
 0x1cc   :  { %v324_v45 = vadd.f32 %v323_v42, %v320_v40 }
 0x1cd   :  { %v944_v25 = vadd.f32 %v238_v17, %v236_v19  ;;  %v954_v36 = vadd.f32 %v260_v29, %v258_v26  ;;  %v958_v38 = vadd.f32 %v282_v34, %v280_v31  ;;  %v963_v44 = vadd.f32 %v304_v41, %v302_v39 }
 0x1ce   :  { %v968_v48 = vadd.f32 %v326_v46, %v324_v45 }
 0x1cf   :  { %328 = vadd.xlane.f32.xlu0 %v944_v25  ;;  %v337_v30 = vmul.f32 %v944_v25, %v944_v25  ;;  %v374_v43 = vmul.f32 %v954_v36, %v954_v36  ;;  %v411_v47 = vmul.f32 %v958_v38, %v958_v38  ;;  %v448_v49 = vmul.f32 %v963_v44, %v963_v44 }
 0x1d0   :  { %v485_v50 = vmul.f32 %v968_v48, %v968_v48 }
 0x1d1   :  { %338 = vadd.xlane.f32.xlu1 %v337_v30 }
 0x1d3   :  { %365 = vadd.xlane.f32.xlu0 %v954_v36 }
 0x1d5   :  { %402 = vadd.xlane.f32.xlu1 %v958_v38 }
 0x1d7   :  { %375 = vadd.xlane.f32.xlu0 %v374_v43 }
 0x1d9   :  { %439 = vadd.xlane.f32.xlu1 %v963_v44 }
 0x1db   :  { %412 = vadd.xlane.f32.xlu0 %v411_v47 }
 0x1dd   :  { %476 = vadd.xlane.f32.xlu1 %v968_v48 }
 0x1df   :  { %449 = vadd.xlane.f32.xlu0 %v448_v49 }
 0x1e3   :  { %486 = vadd.xlane.f32.xlu0 %v485_v50 }
 0x25c   :  { %v329_v51 = vpop.xlane.xlu0 %328 }
 0x25d   :  { %v330_v52 = vrot.slane %v329_v51, 4 }
 0x25e   :  { %v339_v53 = vpop.xlane.xlu1 %338 }
 0x25f   :  { %v331_v54 = vadd.f32 %v330_v52, %v329_v51  ;;  %v340_v55 = vrot.slane %v339_v53, 4 }
 0x260   :  { %v366_v1 = vpop.xlane.xlu0 %365 }
 0x261   :  { %v332_v56 = vrot.slane %v331_v54, 2  ;;  %v341_v57 = vadd.f32 %v340_v55, %v339_v53  ;;  %v367_v3 = vrot.slane %v366_v1, 4 }
 0x262   :  { %v403_v18 = vpop.xlane.xlu1 %402 }
 0x263   :  { %v342_v58 = vrot.slane %v341_v57, 2  ;;  %v333_v59 = vadd.f32 %v332_v56, %v331_v54  ;;  %v368_v5 = vadd.f32 %v367_v3, %v366_v1  ;;  %v404_v20 = vrot.slane %v403_v18, 4 }
 0x264   :  { %v376_v2 = vpop.xlane.xlu0 %375 }
 0x265   :  { %v334_v60 = vrot.slane %v333_v59, 1  ;;  %v343_v61 = vadd.f32 %v342_v58, %v341_v57  ;;  %v377_v4 = vrot.slane %v376_v2, 4  ;;  %v369_v7 = vrot.slane %v368_v5, 2 }
 0x266   :  { %v405_v23 = vadd.f32 %v404_v20, %v403_v18  ;;  %v440_v40 = vpop.xlane.xlu1 %439 }
 0x267   :  { %v335_v62 = vadd.f32 %v334_v60, %v333_v59  ;;  %v344_v63 = vrot.slane %v343_v61, 1  ;;  %v378_v6 = vadd.f32 %v377_v4, %v376_v2  ;;  %v370_v10 = vadd.f32 %v369_v7, %v368_v5 }
 0x268   :  { %v413_v19 = vpop.xlane.xlu0 %412  ;;  %v406_v29 = vrot.slane %v405_v23, 2  ;;  %v441_v42 = vrot.slane %v440_v40, 4 }
 0x269   :  { %611 = vpush %v335_v62  ;;  %v345_v0 = vadd.f32 %v344_v63, %v343_v61  ;;  %v379_v8 = vrot.slane %v378_v6, 2  ;;  %v371_v13 = vrot.slane %v370_v10, 1  ;;  %v414_v21 = vrot.slane %v413_v19, 4 }
 0x26a   :  { %v407_v33 = vadd.f32 %v406_v29, %v405_v23  ;;  %v442_v46 = vadd.f32 %v441_v42, %v440_v40  ;;  %v477_v62 = vpop.xlane.xlu1 %476 }
 0x26b   :  { %613 = vpush %v345_v0  ;;  %v380_v11 = vadd.f32 %v379_v8, %v378_v6  ;;  %v372_v16 = vadd.f32 %v371_v13, %v370_v10  ;;  %v415_v26 = vadd.f32 %v414_v21, %v413_v19  ;;  %v478_v0 = vrot.slane %v477_v62, 4 }
 0x26c   :  { %v408_v12 = vrot.slane %v407_v33, 1  ;;  %v450_v41 = vpop.xlane.xlu0 %449  ;;  %v443_v52 = vrot.slane %v442_v46, 2 }
 0x26d   :  { %v381_v14 = vrot.slane %v380_v11, 1  ;;  %v416_v31 = vrot.slane %v415_v26, 2  ;;  %v451_v43 = vrot.slane %v450_v41, 4  ;;  %v479_v3 = vadd.f32 %v478_v0, %v477_v62 }
 0x26e   :  { %v409_v39 = vadd.f32 %v408_v12, %v407_v33  ;;  %v444_v56 = vadd.f32 %v443_v52, %v442_v46 }
 0x26f   :  { %v382_v17 = vadd.f32 %v381_v14, %v380_v11  ;;  %v417_v34 = vadd.f32 %v416_v31, %v415_v26  ;;  %v452_v49 = vadd.f32 %v451_v43, %v450_v41  ;;  %v480_v8 = vrot.slane %v479_v3, 2 }
 0x270   :  { %v445_v58 = vrot.slane %v444_v56, 1  ;;  %v487_v63 = vpop.xlane.xlu0 %486 }
 0x271   :  { %v418_v35 = vrot.slane %v417_v34, 1  ;;  %v453_v54 = vrot.slane %v452_v49, 2  ;;  %v488_v1 = vrot.slane %v487_v63, 4  ;;  %v481_v13 = vadd.f32 %v480_v8, %v479_v3 }
 0x272   :  { %v446_v61 = vadd.f32 %v445_v58, %v444_v56 }
 0x273   :  { %v454_v57 = vadd.f32 %v453_v54, %v452_v49  ;;  %v489_v5 = vadd.f32 %v488_v1, %v487_v63 }
 0x275   :  { %v455_v59 = vrot.slane %v454_v57, 1  ;;  %v490_v10 = vrot.slane %v489_v5, 2 }
 0x277   :  { %v491_v14 = vadd.f32 %v490_v10, %v489_v5 }
 0x29a   :  { %s612_s2 = spop %611 }
 0x29b   :  { %s975_s14 = smul.f32 0.0009765625, %s612_s2 }
 0x29c   :  { %s614_s16 = spop %613 }
 0x29d   :  { %s349_s15 = smul.f32 %s975_s14, %s975_s14 }
 0x29e   :  { %s348_s17 = smul.f32 0.0009765625, %s614_s16  ;;  %s576_s16 = sld [smem:[#allocation7 + $0x2]] }
 0x2a0   :  { %s350_s5 = ssub.f32 %s348_s17, %s349_s15  ;;  %s577_s17 = sld [smem:[#allocation8 + $0x2]] }
 0x2a2   :  { %s352_s6 = sadd.f32 1e-05, %s350_s5 }
 0x2a4   :  { %v353_v9 = vstv %s352_s6 }
 0x2a5   :  { %662 = vrsqrt.f32 %v353_v9 }
 0x2af   :  { %v663_v15 = vpop.eup %662 }
 0x2b0   :  { %615 = vpush %v663_v15  ;;  %v482_v15 = vrot.slane %v481_v13, 1 }
 0x2b1   :  { %617 = vpush %v372_v16  ;;  %v492_v16 = vrot.slane %v491_v14, 1 }
 0x2b2   :  { %619 = vpush %v382_v17  ;;  %v483_v18 = vadd.f32 %v482_v15, %v481_v13 }
 0x2e1   :  { %s616_s20 = spop %615 }
 0x2e2   :  { %s356_s21 = smul.f32 %s616_s20, %s351_s18  ;;  %s618_s22 = spop %617 }
 0x2e3   :  { %s979_s23 = smul.f32 0.0009765625, %s618_s22  ;;  %s620_s24 = spop %619 }
 0x2e4   :  { %s358_s25 = smul.f32 %s356_s21, %s975_s14  ;;  %v360_v22 = vstv %s356_s21 }
 0x2e5   :  { %s386_s26 = smul.f32 %s979_s23, %s979_s23  ;;  %v361_v24 = vmul.f32 %v360_v22, %v944_v25  ;;  %v419_v25 = vadd.f32 %v418_v35, %v417_v34 }
 0x2e6   :  { %s359_s27 = ssub.f32 %s357_s19, %s358_s25  ;;  %s385_s28 = smul.f32 0.0009765625, %s620_s24 }
 0x2e8   :  { %v362_v27 = vstv %s359_s27  ;;  %s387_s29 = ssub.f32 %s385_s28, %s386_s26  ;;  %s578_s27 = sld [smem:[#allocation7 + $0x3]] }
 0x2e9   :  { %v363_v28 = vadd.f32 %v362_v27, %v361_v24  ;;  %s579_s28 = sld [smem:[#allocation8 + $0x3]] }
 0x2ea   :  { %s389_s30 = sadd.f32 1e-05, %s387_s29 }
 0x2eb   :  { %v364_v30 = vmax.f32 %v363_v28, 0.0 }
 0x2ec   :  { %v390_v32 = vstv %s389_s30 }
 0x2ed   :  { %513 = vst [vmem:[#allocation10] sm:$0xff] %v364_v30  ;;  %664 = vrsqrt.f32 %v390_v32 }
 0x2f7   :  { %v665_v37 = vpop.eup %664 }
 0x2f8   :  { %621 = vpush %v665_v37 }
 0x2f9   :  { %623 = vpush %v409_v39 }
 0x2fa   :  { %625 = vpush %v419_v25 }
 0x329   :  { %s622_s4 = spop %621 }
 0x32a   :  { %s393_s3 = smul.f32 %s622_s4, %s574_s8  ;;  %s624_s10 = spop %623 }
 0x32b   :  { %s985_s11 = smul.f32 0.0009765625, %s624_s10  ;;  %s626_s12 = spop %625 }
 0x32c   :  { %s395_s13 = smul.f32 %s393_s3, %s979_s23  ;;  %v397_v45 = vstv %s393_s3 }
 0x32d   :  { %s423_s1 = smul.f32 %s985_s11, %s985_s11  ;;  %v398_v47 = vmul.f32 %v397_v45, %v954_v36  ;;  %v456_v36 = vadd.f32 %v455_v59, %v454_v57 }
 0x32e   :  { %s396_s0 = ssub.f32 %s575_s9, %s395_s13  ;;  %s422_s2 = smul.f32 0.0009765625, %s626_s12 }
 0x330   :  { %v399_v50 = vstv %s396_s0  ;;  %s424_s14 = ssub.f32 %s422_s2, %s423_s1  ;;  %s580_s0 = sld [smem:[#allocation7 + $0x4]] }
 0x331   :  { %v400_v51 = vadd.f32 %v399_v50, %v398_v47  ;;  %s581_s2 = sld [smem:[#allocation8 + $0x4]] }
 0x332   :  { %s426_s15 = sadd.f32 1e-05, %s424_s14 }
 0x333   :  { %v401_v53 = vmax.f32 %v400_v51, 0.0 }
 0x334   :  { %v427_v55 = vstv %s426_s15 }
 0x335   :  { %514 = vst [vmem:[#allocation10 + $0x8] sm:$0xff] %v401_v53  ;;  %666 = vrsqrt.f32 %v427_v55 }
 0x33f   :  { %v667_v60 = vpop.eup %666 }
 0x340   :  { %627 = vpush %v667_v60 }
 0x341   :  { %629 = vpush %v446_v61 }
 0x342   :  { %631 = vpush %v456_v36 }
 0x371   :  { %s628_s5 = spop %627 }
 0x372   :  { %s430_s6 = smul.f32 %s628_s5, %s576_s16  ;;  %s630_s18 = spop %629 }
 0x373   :  { %s991_s19 = smul.f32 0.0009765625, %s630_s18  ;;  %s632_s20 = spop %631 }
 0x374   :  { %s432_s21 = smul.f32 %s430_s6, %s985_s11  ;;  %v434_v2 = vstv %s430_s6  ;;  %s760_s5 = smov [#allocation10]  }
 0x375   :  { %s460_s22 = smul.f32 %s991_s19, %s991_s19  ;;  %v435_v4 = vmul.f32 %v434_v2, %v958_v38  ;;  %v493_v38 = vadd.f32 %v492_v16, %v491_v14  ;;  %s523_s6 = sshll.u32 %s760_s5, 4  ;;  %s524_s6 = int_to_ptr.vmem [resolvable:$true] %s523_s6 }
 0x376   :  { %s433_s23 = ssub.f32 %s577_s17, %s432_s21  ;;  %s459_s24 = smul.f32 0.0009765625, %s632_s20 }
 0x377   :  { %s720_s18 = scalar_lea.vmem %s524_s6, 640  ;;  %p725_p7 = scmp.lt.s32.totalorder %s524_s6, %s524_s6 }
 0x378   :  { %v436_v6 = vstv %s433_s23  ;;  %s461_s25 = ssub.f32 %s459_s24, %s460_s22  ;;  %p721_p6 = scmp.ne.s32.totalorder %s524_s6, %s720_s18 }
 0x379   :  { %v437_v7 = vadd.f32 %v436_v6, %v435_v4  ;;  %p726_p8 = scmp.lt.s32.totalorder %s720_s18, %s720_s18 }
 0x37a   :  { %s463_s26 = sadd.f32 1e-05, %s461_s25 }
 0x37b   :  { %v438_v9 = vmax.f32 %v437_v7, 0.0  ;;  %p727_p9 = por %p726_p8, %p725_p7 }
 0x37c   :  { %v464_v11 = vstv %s463_s26 }
 0x37d   :  { %515 = vst [vmem:[#allocation10 + $0x10] sm:$0xff] %v438_v9  ;;  %668 = vrsqrt.f32 %v464_v11  ;;  %p728_p10 = pnand %p727_p9, %p721_p6 }
 0x387   :  { %v669_v17 = vpop.eup %668 }
 0x388   :  { %633 = vpush %v669_v17 }
 0x389   :  { %635 = vpush %v483_v18 }
 0x38a   :  { %637 = vpush %v493_v38 }
 0x3b9   :  { %s634_s29 = spop %633 }
 0x3ba   :  { %s467_s30 = smul.f32 %s634_s29, %s578_s27  ;;  %s636_s8 = spop %635 }
 0x3bb   :  { %s495_s9 = smul.f32 0.0009765625, %s636_s8  ;;  %s638_s4 = spop %637 }
 0x3bc   :  { %s469_s3 = smul.f32 %s467_s30, %s991_s19  ;;  %v471_v19 = vstv %s467_s30 }
 0x3bd   :  { %s497_s10 = smul.f32 %s495_s9, %s495_s9  ;;  %v472_v20 = vmul.f32 %v471_v19, %v963_v44 }
 0x3be   :  { %s470_s11 = ssub.f32 %s579_s28, %s469_s3  ;;  %s496_s12 = smul.f32 0.0009765625, %s638_s4 }
 0x3c0   :  { %v473_v21 = vstv %s470_s11  ;;  %s498_s13 = ssub.f32 %s496_s12, %s497_s10 }
 0x3c1   :  { %v474_v22 = vadd.f32 %v473_v21, %v472_v20 }
 0x3c2   :  { %s500_s1 = sadd.f32 1e-05, %s498_s13 }
 0x3c3   :  { %v475_v23 = vmax.f32 %v474_v22, 0.0 }
 0x3c4   :  { %v501_v24 = vstv %s500_s1 }
 0x3c5   :  { %516 = vst [vmem:[#allocation10 + $0x18] sm:$0xff] %v475_v23  ;;  %670 = vrsqrt.f32 %v501_v24 }
 0x3cf   :  { %v671_v26 = vpop.eup %670 }
 0x3d0   :  { %639 = vpush %v671_v26 }
 0x401   :  { %s640_s14 = spop %639 }
 0x402   :  { %s504_s15 = smul.f32 %s640_s14, %s580_s0 }
 0x404   :  { %s506_s16 = smul.f32 %s504_s15, %s495_s9  ;;  %v508_v27 = vstv %s504_s15 }
 0x405   :  { %v509_v28 = vmul.f32 %v508_v27, %v968_v48 }
 0x406   :  { %s507_s17 = ssub.f32 %s581_s2, %s506_s16 }
 0x408   :  { %v510_v44 = vstv %s507_s17 }
 0x409   :  { %v511_v29 = vadd.f32 %v510_v44, %v509_v28 }
 0x40b   :  { %v512_v30 = vmax.f32 %v511_v29, 0.0 }
 0x40d   :  { %517 = vst [vmem:[#allocation10 + $0x20] sm:$0xff] %v512_v30 }
 0x40e   :  { %731 = shalt.err (!%p728_p10)
}
 0x40f   :  { %s732_s21 = scalar_lea.hbm %s1019_s7, 640 }
 0x410   :  { %p733_p11 = scmp.ne.s32.totalorder %s1019_s7, %s732_s21  ;;  %p736_p12 = scmp.lt.u32.totalorder %s732_s21, %s1019_s7 }
 0x412   :  { %p738_p13 = pnand %p736_p12, %p733_p11 }
 0x414   :  { %741 = shalt.err (!%p738_p13)
}
 0x415   :  { %s761_s26 = smov 128   ;;  %s762_s27 = smov 8  }
 0x416   :  { %529 = dma.vmem_to_hbm [thread:$0]  %s524_s6, 640, %s1019_s7, [#allocation3], %s761_s26, %s761_s26, %s762_s27  }
 0x417   :  { %748 = dma.done.wait [#allocation3], 640  }
 0x418   :  { %749 = vsyncadd [#allocation3], 4294966656 }
 0x419   :  { %533 = vsyncpa [#allocation3], 1 }
 0x41a   :  { %534 = vsyncpa [#allocation4], 1 }
 0x41b   :  { %535 = vsyncpa [#allocation6], 1 }
 0x41c   :  { %536 = vsyncpa [#allocation9], 1 }

</bundles_post_ra>
